<compile_context>
chip_gen: v5e
topology: v5e:2x2
jax: 0.10.0
libtpu: 0.0.40
codegen_flags: <defaults>
</compile_context>

<pallas_src>
import math

import jax
import jax.numpy as jnp
from jax.experimental import pallas as pl
from jax.experimental.pallas import tpu as pltpu


# VMEM sizing (valid across v5e / v6e / v7x).
_RESIDENT_BUDGET = 24 * 1024 * 1024    # sum of all resident pipeline buffers
_VMEM_LIMIT = 32 * 1024 * 1024         # explicit scoped-VMEM limit
_MAX_X_BLOCK_BYTES = 4 * 1024 * 1024   # diminishing roofline returns beyond this
_MIN_X_BLOCK_BYTES = 1 * 1024 * 1024   # fold batch only if blocks stay >= this (or cover S)


def _build_pe(embedding_dim: int, max_len: int = 5000) -> jnp.ndarray:
    """Reproduces the PyTorch buffer construction exactly (float32)."""
    assert embedding_dim % 2 == 0, "embedding_dim must be even (PyTorch module limitation)"
    pos = jnp.arange(0, max_len, dtype=jnp.float32)[:, None]              # (L, 1)
    denominator = jnp.exp(
        jnp.arange(0, embedding_dim, 2, dtype=jnp.float32)
        * (-math.log(10000.0) / embedding_dim)
    )                                                                      # (D/2,)
    angles = pos / denominator                                             # (L, D/2)
    pe = jnp.zeros((max_len, embedding_dim), dtype=jnp.float32)
    pe = pe.at[:, 0::2].set(jnp.sin(angles))
    pe = pe.at[:, 1::2].set(jnp.cos(angles))
    return pe[None, :, :]                                                  # (1, L, D)


def _add_pe_kernel(x_ref, pe_ref, o_ref):
    # One VPU add in the promoted dtype; single downcast at the store.
    # pe_ref broadcasts over the leading (batch) dim when batch is folded.
    o_ref[...] = (x_ref[...] + pe_ref[...]).astype(o_ref.dtype)


def _round_down(v: int, m: int) -> int:
    return (v // m) * m


def _sublane_rows(*dtypes) -> int:
    # Sublane packing: 8 rows for 32-bit, 16 for bf16/f16, 32 for int8/fp8.
    return max(max(32 // jnp.dtype(d).itemsize for d in dtypes), 8)


def _forward_seq_tiled(x, pe, out_dtype, seq_tile, donate_x):
    """Main path (D % 128 == 0): sequence-tiled, optionally batch-folded blocks."""
    B, S, D = x.shape
    xi = jnp.dtype(x.dtype).itemsize
    oi = jnp.dtype(out_dtype).itemsize
    pi = jnp.dtype(pe.dtype).itemsize
    sub = _sublane_rows(x.dtype, out_dtype, pe.dtype)

    def max_rows(fold_batch: bool, pe_bufs: int) -> int:
        per_row = D * ((2 * xi + 2 * oi) * (B if fold_batch else 1) + pe_bufs * pi)
        x_row = D * xi * (B if fold_batch else 1)
        rows_budget = _RESIDENT_BUDGET // per_row
        rows_cap = _MAX_X_BLOCK_BYTES // x_row
        return max(min(rows_budget, rows_cap), 1)

    # Fold batch into the block when that still allows >= ~1 MiB x blocks
    # (or covers the whole sequence): Bx fewer grid steps, identical pe traffic.
    rows_fold = max_rows(fold_batch=True, pe_bufs=2)
    need_rows = min(S, -(-_MIN_X_BLOCK_BYTES // (B * D * xi)))
    fold_batch = rows_fold >= min(S, max(need_rows, sub))

    single_buffer_pe = (not fold_batch) and B >= 8
    rows = rows_fold if fold_batch else max_rows(False, 1 if single_buffer_pe else 2)

    if seq_tile is not None:
        tS = int(seq_tile)
    elif S <= sub:
        tS = S
    else:
        tS = max(_round_down(min(S, rows), sub), sub)

    num_s = pl.cdiv(S, tS)   # masked edge block when S % tS != 0

    if fold_batch:
        grid = (num_s,)
        x_spec = pl.BlockSpec((B, tS, D), lambda s: (0, s, 0))
        pe_spec = pl.BlockSpec((1, tS, D), lambda s: (0, s, 0))
        o_spec = pl.BlockSpec((B, tS, D), lambda s: (0, s, 0))
        dims = ("parallel",)
    else:
        grid = (num_s, B)    # batch innermost -> pe block DMA skipped across b
        x_spec = pl.BlockSpec((1, tS, D), lambda s, b: (b, s, 0))
        o_spec = pl.BlockSpec((1, tS, D), lambda s, b: (b, s, 0))
        pe_idx = lambda s, b: (0, s, 0)
        if single_buffer_pe:
            pe_spec = pl.BlockSpec((1, tS, D), pe_idx, pipeline_mode=pl.Buffered(1))
        else:
            pe_spec = pl.BlockSpec((1, tS, D), pe_idx)
        dims = ("parallel", "parallel")

    aliases = {0: 0} if (donate_x and jnp.dtype(x.dtype) == jnp.dtype(out_dtype)) else {}

    return pl.pallas_call(
        _add_pe_kernel,
        out_shape=jax.ShapeDtypeStruct((B, S, D), out_dtype),
        grid_spec=pltpu.PrefetchScalarGridSpec(
            num_scalar_prefetch=0,
            grid=grid,
            in_specs=[x_spec, pe_spec],
            out_specs=o_spec,
        ),
        compiler_params=pltpu.CompilerParams(
            dimension_semantics=dims,
            vmem_limit_bytes=_VMEM_LIMIT,
        ),
        input_output_aliases=aliases,
    )(x, pe)


def _forward_flat(x, pe, out_dtype):
    """Fallback path (D % 128 != 0): flatten (S, D) -> S*D and tile lane-dense."""
    B, S, D = x.shape
    F = S * D
    if F < 128:
        return (x + pe[:, :S, :]).astype(out_dtype)

    xi = jnp.dtype(x.dtype).itemsize
    oi = jnp.dtype(out_dtype).itemsize
    pi = jnp.dtype(pe.dtype).itemsize

    x2 = x.reshape(B, F)
    pe2 = pe[:, :S, :].reshape(1, F)

    per_col = B * (2 * xi + 2 * oi) + 2 * pi
    cols_budget = max(_RESIDENT_BUDGET // per_col, 128)
    cols_cap = max(_MAX_X_BLOCK_BYTES // (B * xi), 128)
    tF = max(_round_down(min(F, cols_budget, cols_cap), 128), 128)

    out2 = pl.pallas_call(
        _add_pe_kernel,
        out_shape=jax.ShapeDtypeStruct((B, F), out_dtype),
        grid_spec=pltpu.PrefetchScalarGridSpec(
            num_scalar_prefetch=0,
            grid=(pl.cdiv(F, tF),),
            in_specs=[pl.BlockSpec((B, tF), lambda f: (0, f)),
                      pl.BlockSpec((1, tF), lambda f: (0, f))],
            out_specs=pl.BlockSpec((B, tF), lambda f: (0, f)),
        ),
        compiler_params=pltpu.CompilerParams(
            dimension_semantics=("parallel",),
            vmem_limit_bytes=_VMEM_LIMIT,
        ),
    )(x2, pe2)
    return out2.reshape(B, S, D)


def positional_encoder_forward(
    x: jnp.ndarray,
    pe: jnp.ndarray,
    *,
    seq_tile: int | None = None,
    min_pallas_elems: int = 1 << 20,
    donate_x: bool = False,
) -> jnp.ndarray:
    """x: (B, S, D); pe: (1, max_len, D). Returns x + pe[:, :S, :].

    donate_x=True requests output aliasing onto x's HBM buffer; only set it
    when the caller actually donates x (e.g. jax.jit donate_argnums),
    otherwise XLA inserts a defensive copy of x before the call.
    """
    B, S, D = x.shape
    assert pe.ndim == 3 and pe.shape[0] == 1 and pe.shape[2] == D
    assert pe.shape[1] >= S, "sequence length exceeds positional-encoding max_len"
    out_dtype = jnp.result_type(x.dtype, pe.dtype)

    # Tiny problems: a standalone kernel launch never beats XLA's fused add.
    if x.size < min_pallas_elems:
        return (x + pe[:, :S, :]).astype(out_dtype)

    if D % 128 == 0:
        return _forward_seq_tiled(x, pe, out_dtype, seq_tile, donate_x)
    return _forward_flat(x, pe, out_dtype)


if __name__ == "__main__":
    key = jax.random.PRNGKey(0)

    # Main path: D = 128 (lane-dense), seq_tile=64 so the grid has 2 s-tiles.
    B, S, D, MAX_LEN = 2, 128, 128, 256
    x = jax.random.normal(key, (B, S, D), dtype=jnp.float32)
    pe = _build_pe(D, MAX_LEN)
    ref = x + pe[:, :S, :]

    out = positional_encoder_forward(x, pe, seq_tile=64, min_pallas_elems=0)
    out = jax.block_until_ready(out)
    assert out.shape == (B, S, D) and out.dtype == ref.dtype
    assert jnp.allclose(out, ref, atol=1e-6), "seq-tiled path mismatch"

    # Default byte-targeted tile selection on the same input.
    out2 = jax.block_until_ready(positional_encoder_forward(x, pe, min_pallas_elems=0))
    assert jnp.allclose(out2, ref, atol=1e-6), "auto-tile path mismatch"

    # Lane-dense flattened path for D not a multiple of 128.
    B2, S2, D2 = 2, 32, 64
    x2 = jax.random.normal(jax.random.PRNGKey(0), (B2, S2, D2), dtype=jnp.float32)
    pe2 = _build_pe(D2, 128)
    ref2 = x2 + pe2[:, :S2, :]
    out3 = jax.block_until_ready(positional_encoder_forward(x2, pe2, min_pallas_elems=0))
    assert out3.shape == (B2, S2, D2)
    assert jnp.allclose(out3, ref2, atol=1e-6), "flattened path mismatch"

    print("KERNEL_OK")
</pallas_src>

<mosaic_0001>
module attributes {stable_mosaic.version = 11 : i64} {
  func.func @_add_pe_kernel(%arg0: i32, %arg1: memref<2x64x128xf32, #tpu.memory_space<vmem>>, %arg2: memref<1x64x128xf32, #tpu.memory_space<vmem>>, %arg3: memref<2x64x128xf32, #tpu.memory_space<vmem>>) attributes {dimension_semantics = [#tpu.dimension_semantics<parallel>], iteration_bounds = array<i64: 2>, scalar_prefetch = 0 : i64, scratch_operands = 0 : i64, tpu.core_type = #tpu.core_type<tc>, window_params = [{transform_indices = @transform_0, window_bounds = array<i64: 2, 64, 128>}, {transform_indices = @transform_1, window_bounds = array<i64: 1, 64, 128>}, {transform_indices = @transform_2, window_bounds = array<i64: 2, 64, 128>}]} {
    %c0 = arith.constant 0 : index
    %c0_0 = arith.constant 0 : index
    %c0_1 = arith.constant 0 : index
    %0 = vector.load %arg1[%c0, %c0_0, %c0_1] : memref<2x64x128xf32, #tpu.memory_space<vmem>>, vector<2x64x128xf32>
    %c0_2 = arith.constant 0 : index
    %c0_3 = arith.constant 0 : index
    %c0_4 = arith.constant 0 : index
    %1 = vector.load %arg2[%c0_2, %c0_3, %c0_4] : memref<1x64x128xf32, #tpu.memory_space<vmem>>, vector<1x64x128xf32>
    %2 = vector.broadcast %1 : vector<1x64x128xf32> to vector<2x64x128xf32>
    %3 = arith.addf %0, %2 : vector<2x64x128xf32>
    %c0_5 = arith.constant 0 : index
    %c0_6 = arith.constant 0 : index
    %c0_7 = arith.constant 0 : index
    %4 = vector.load %arg3[%c0_5, %c0_6, %c0_7] : memref<2x64x128xf32, #tpu.memory_space<vmem>>, vector<2x64x128xf32>
    tpu.vector_store %arg3[%c0_5, %c0_6, %c0_7], %3 {strides = array<i32>} : memref<2x64x128xf32, #tpu.memory_space<vmem>>, vector<2x64x128xf32>,
    return
  }
  func.func @transform_0(%arg0: i32) -> (i32, i32, i32) {
    %c0_i32 = arith.constant 0 : i32
    %c0_i32_0 = arith.constant 0 : i32
    %c0_i32_1 = arith.constant 0 : i32
    return %c0_i32, %arg0, %c0_i32_0 : i32, i32, i32
  }
  func.func @transform_1(%arg0: i32) -> (i32, i32, i32) {
    %c0_i32 = arith.constant 0 : i32
    %c0_i32_0 = arith.constant 0 : i32
    %c0_i32_1 = arith.constant 0 : i32
    return %c0_i32, %arg0, %c0_i32_0 : i32, i32, i32
  }
  func.func @transform_2(%arg0: i32) -> (i32, i32, i32) {
    %c0_i32 = arith.constant 0 : i32
    %c0_i32_0 = arith.constant 0 : i32
    %c0_i32_1 = arith.constant 0 : i32
    return %c0_i32, %arg0, %c0_i32_0 : i32, i32, i32
  }
}

</mosaic_0001>

<bundles_post_ra>
// kernel: tpu_custom_call.1
= control target key start
LH: loop header
LB: loop body
LE: loop exit
PB: predicated region body
PF: predicated region fallthrough
CT: control target
= control target key end

     0   :  { %7 = vsyncpa [#allocation3], 0  ;;  %s807_s0 = inlined_call_operand.hbm [shape: f32[2,128,128], index: 0, kind: input, shape index: {}]   ;;  %s808_s1 = inlined_call_operand.hbm [shape: f32[1,256,128], index: 1, kind: input, shape index: {}]   ;;  %s809_s2 = inlined_call_operand.hbm [shape: f32[2,128,128], index: 2, kind: output, shape index: {}]  }
   0x1   :  { %9 = vsyncpa [#allocation3 + $0x1], 0 }
   0x2   :  { %10 = vsyncpa [#allocation6], 0 }
   0x3   :  { %12 = vsyncpa [#allocation6 + $0x1], 0 }
   0x4   :  { %13 = vsyncpa [#allocation4], 0 }
   0x5   :  { %15 = vsyncpa [#allocation4 + $0x1], 0  ;;  %s617_s9 = smov 0   ;;  %s619_s10 = smov 0  }
   0x6   :  { %s621_s11 = smov 0   ;;  %s623_s12 = smov 0  }
   0x7 LB: > { %s638_s13 = sadd.s32 4294967295, %s587_s12   ;;  %s425_s14 = sadd.s32 4294967294, %s587_s12   ;;  %s587_s12 = sphi %s623_s12, %s817_s12   ;;  %s583_s11 = sphi %s621_s11, %s816_s11   ;;  %s579_s10 = sphi %s619_s10, %s815_s10   ;;  %s575_s9 = sphi %s617_s9, %s814_s9  }
   0x8   : > { %s642_s15 = sadd.s32 1, %s587_s12   ;;  %s28_s16 = sadd.s32 1, %s583_s11 }
   0x9   : > { %s25_s17 = ssub.s32 %s587_s12, %s642_s15  ;;  %p35_p0 = scmp.ne.s32.totalorder %s583_s11, %s579_s10 }
   0xa   : > { %p26_p1 = scmp.eq.s32.totalorder %s25_s17, 0  ;;  %p36_p2 = scmp.eq.s32.totalorder %s587_s12, 0 }
   0xb   : > { %p41_p3 = scmp.ne.s32.totalorder %s579_s10, %s575_s9  ;;  %p42_p4 = scmp.eq.s32.totalorder %s638_s13, 0 }
   0xc   : > { %s654_s18 = scalar_select %p26_p1, %s583_s11, %s28_s16  }
   0xd   : > { %p656_p5 = por %p36_p2, %p35_p0  ;;  %p660_p6 = por %p42_p4, %p41_p3 }
   0xe   : > { %p91_p7 = scmp.eq.s32.totalorder %s638_s13, 1  ;;  %p97_p8 = scmp.eq.s32.totalorder %s425_s14, 1 }
   0xf   : > { %p427_p11 = scmp.ge.s32.totalorder %s587_s12, 2 }
  0x10   : > { %p665_p9 = por %p91_p7, %p35_p0  ;;  %p669_p10 = por %p97_p8, %p41_p3 }
  0x11   : > { %113 = sbr.rel (%p427_p11) target bundleno = 51 (0x33), region = 16 }
  0x16   : > { %s677_s23 = sand.u32 1, %s583_s11   ;;  %s445_s24 = sshll.u32 %s587_s12, 6 }
  0x17   : > { %s428_s25 = sshll.u32 %s677_s23, 7  ;;  %s126_s28 = scalar_lea.hbm %s807_s0, %s445_s24 }
  0x18   : > { %s448_s29 = scalar_select %p656_p5, [#allocation0], [#allocation12] }
  0x19   : > { %s139_s30 = sshll.u32 %s126_s28, 4  ;;  %s121_s3 = scalar_lea.vmem [#allocation2], %s428_s25  ;;  %s140_s30 = int_to_ptr.hbm [resolvable:$true] %s139_s30 }
  0x1a   : > { %s141_s4 = sshll.u32 %s121_s3, 4  ;;  %s131_s5 = sld [smem:[%s448_s29]]   ;;  %s142_s4 = int_to_ptr.vmem [resolvable:$true] %s141_s4 }
  0x1b   : > { %s589_s6 = smov 2048   ;;  %s590_s7 = smov 1024  }
  0x1c   : > { %449 = sst [smem:[#allocation9]] (%p656_p5), %s589_s6  ;;  %s591_s8 = smov 8  }
  0x1d   : > { %450 = sst [smem:[#allocation9 + $0x1]] (%p656_p5), %s590_s7  ;;  %s592_s14 = smov 128  }
  0x1e   : > { %451 = sst [smem:[#allocation9 + $0x2]] (%p656_p5), %s591_s8  ;;  %s118_s25 = scalar_lea.sflag [#allocation3], %s677_s23 }
  0x1f   : > { %452 = sst [smem:[#allocation9 + $0x3]] (%p656_p5), %s592_s14  ;;  %s593_s26 = smov [#allocation8]  }
  0x20   : > { %s431_s16 = sshll.u32 %s131_s5, 26  ;;  %453 = sst [smem:[#allocation9 + $0x4]] (%p656_p5), %s592_s14 }
  0x21   : > { %s432_s17 = sadd.s32 134217728, %s431_s16  ;;  %454 = sst [smem:[#allocation9 + $0x5]] (%p656_p5), %s591_s8 }
  0x22   : > { %455 = dma.general (%p656_p5), %s140_s30, 2048, %s142_s4, %s118_s25, %s593_s26, [#allocation9], %s432_s17, 0  }
  0x23   : > { %s433_s27 = sshll.u32 %s677_s23, 6  ;;  %s173_s3 = scalar_lea.hbm %s808_s1, %s445_s24 }
  0x24   : > { %s174_s6 = sshll.u32 %s173_s3, 4  ;;  %s168_s7 = scalar_lea.vmem [#allocation5], %s433_s27  ;;  %s175_s6 = int_to_ptr.hbm [resolvable:$true] %s174_s6 }
  0x25   : > { %s176_s5 = sshll.u32 %s168_s7, 4  ;;  %s165_s14 = scalar_lea.sflag [#allocation6], %s677_s23  ;;  %s177_s5 = int_to_ptr.vmem [resolvable:$true] %s176_s5 }
  0x26   : > { %s517_s16 = sshra.s32 %s175_s6, 4  ;;  %s523_s17 = scalar_lea.hbm %s808_s1, 256  ;;  %s518_s16 = int_to_ptr.hbm [resolvable:$true] %s517_s16 }
  0x27   : > { %s519_s8 = scalar_lea.hbm %s518_s16, 64  ;;  %p524_p1 = scmp.lt.s32.totalorder %s518_s16, %s808_s1 }
  0x28   : > { %p520_p12 = scmp.ne.s32.totalorder %s518_s16, %s519_s8  ;;  %p525_p2 = scmp.lt.s32.totalorder %s523_s17, %s519_s8 }
  0x2a   : > { %p521_p13 = pnand %p520_p12, %p656_p5  ;;  %p526_p3 = por %p525_p2, %p524_p1 }
  0x2c   : > { %p522_p0 = pneg %p521_p13 }
  0x2e   : > { %p527_p4 = pnand %p526_p3, %p522_p0 }
  0x30   : > { %530 = shalt.err (!%p527_p4)
}
  0x31   : > { %s594_s23 = smov 128   ;;  %s595_s24 = smov 8  }
  0x32   : > { %456 = dma.hbm_to_vmem [thread:$0]  (%p656_p5), %s175_s6, 1024, %s177_s5, %s165_s14, %s594_s23, %s594_s23, %s595_s24  }
  0x33 PF: > { %p436_p7 = scmp.ge.s32.totalorder %s587_s12, 1  ;;  %p184_p8 = scmp.lt.s32.totalorder %s587_s12, 3 }
  0x35   : > { %p185_p12 = pnand %p436_p7, %p184_p8 }
  0x36   : > { %s719_s27 = sand.u32 (!%p185_p12), 1, %s579_s10  }
  0x37   : > { %188 = sbr.rel (%p185_p12) target bundleno = 94 (0x5e), region = 28  ;;  %s437_s28 = sshll.u32 (!%p185_p12), %s719_s27, 7 }
  0x38   : > { %s191_s29 = scalar_lea.sflag (!%p185_p12), [#allocation3], %s719_s27  ;;  %s723_s3 = scalar_lea.vmem (!%p185_p12), [#allocation2], %s437_s28 }
  0x3c   : > { %562 = dma.done.wait (%p660_p6), %s191_s29, 2048  }
  0x3d   : > { %564 = vsyncadd (%p660_p6), %s191_s29, 4294965248  ;;  %s438_s19 = sshll.u32 %s719_s27, 6  ;;  %s201_s6 = scalar_lea.sflag [#allocation6], %s719_s27 }
  0x3e   : > { %s204_s7 = scalar_lea.vmem [#allocation5], %s438_s19 }
  0x3f   : > { %566 = dma.done.wait (%p660_p6), %s201_s6, 1024  }
  0x40   : > { %568 = vsyncadd (%p660_p6), %s201_s6, 4294966272  ;;  %v234_v0 = vld [vmem:[%s723_s3] sm:$0xff]  ;;  %v235_v2 = vld [vmem:[%s723_s3 + $0x8] sm:$0xff]  ;;  %s740_s20 = scalar_lea.vmem [#allocation7], %s437_s28  ;;  %s291_s5 = scalar_lea.sflag [#allocation4], %s719_s27 }
  0x41   : > { %v250_v1 = vld [vmem:[%s204_s7] sm:$0xff]  ;;  %v251_v4 = vld [vmem:[%s204_s7 + $0x8] sm:$0xff]  ;;  %v236_v5 = vld [vmem:[%s723_s3 + $0x10] sm:$0xff] }
  0x42   : > { %v258_v3 = vadd.f32 %v250_v1, %v234_v0  ;;  %v252_v6 = vld [vmem:[%s204_s7 + $0x10] sm:$0xff]  ;;  %v259_v7 = vadd.f32 %v251_v4, %v235_v2  ;;  %v237_v9 = vld [vmem:[%s723_s3 + $0x18] sm:$0xff]  ;;  %v238_v11 = vld [vmem:[%s723_s3 + $0x20] sm:$0xff] }
  0x43   : > { %v260_v8 = vadd.f32 %v252_v6, %v236_v5  ;;  %v253_v10 = vld [vmem:[%s204_s7 + $0x18] sm:$0xff]  ;;  %v254_v13 = vld [vmem:[%s204_s7 + $0x20] sm:$0xff]  ;;  %v239_v14 = vld [vmem:[%s723_s3 + $0x28] sm:$0xff] }
  0x44   : > { %274 = vst [vmem:[%s740_s20] sm:$0xff] %v258_v3  ;;  %v261_v12 = vadd.f32 %v253_v10, %v237_v9  ;;  %v255_v15 = vld [vmem:[%s204_s7 + $0x28] sm:$0xff]  ;;  %v262_v16 = vadd.f32 %v254_v13, %v238_v11  ;;  %v240_v18 = vld [vmem:[%s723_s3 + $0x30] sm:$0xff]  ;;  %v241_v20 = vld [vmem:[%s723_s3 + $0x38] sm:$0xff] }
  0x45   : > { %275 = vst [vmem:[%s740_s20 + $0x8] sm:$0xff] %v259_v7  ;;  %v263_v17 = vadd.f32 %v255_v15, %v239_v14  ;;  %v256_v19 = vld [vmem:[%s204_s7 + $0x30] sm:$0xff]  ;;  %v257_v22 = vld [vmem:[%s204_s7 + $0x38] sm:$0xff]  ;;  %v242_v23 = vld [vmem:[%s723_s3 + $0x40] sm:$0xff] }
  0x46   : > { %276 = vst [vmem:[%s740_s20 + $0x10] sm:$0xff] %v260_v8  ;;  %v264_v21 = vadd.f32 %v256_v19, %v240_v18  ;;  %v243_v24 = vld [vmem:[%s723_s3 + $0x48] sm:$0xff]  ;;  %v265_v25 = vadd.f32 %v257_v22, %v241_v20  ;;  %v244_v26 = vld [vmem:[%s723_s3 + $0x50] sm:$0xff]  ;;  %v266_v27 = vadd.f32 %v250_v1, %v242_v23  ;;  %v245_v28 = vld [vmem:[%s723_s3 + $0x58] sm:$0xff] }
  0x47   : > { %277 = vst [vmem:[%s740_s20 + $0x18] sm:$0xff] %v261_v12  ;;  %v267_v29 = vadd.f32 %v251_v4, %v243_v24  ;;  %v246_v30 = vld [vmem:[%s723_s3 + $0x60] sm:$0xff]  ;;  %v268_v31 = vadd.f32 %v252_v6, %v244_v26  ;;  %v247_v32 = vld [vmem:[%s723_s3 + $0x68] sm:$0xff]  ;;  %v269_v33 = vadd.f32 %v253_v10, %v245_v28  ;;  %v248_v34 = vld [vmem:[%s723_s3 + $0x70] sm:$0xff] }
  0x48   : > { %278 = vst [vmem:[%s740_s20 + $0x20] sm:$0xff] %v262_v16  ;;  %v270_v35 = vadd.f32 %v254_v13, %v246_v30  ;;  %v249_v36 = vld [vmem:[%s723_s3 + $0x78] sm:$0xff]  ;;  %v271_v37 = vadd.f32 %v255_v15, %v247_v32  ;;  %v272_v38 = vadd.f32 %v256_v19, %v248_v34 }
  0x49   : > { %279 = vst [vmem:[%s740_s20 + $0x28] sm:$0xff] %v263_v17  ;;  %v273_v39 = vadd.f32 %v257_v22, %v249_v36 }
  0x4a   : > { %280 = vst [vmem:[%s740_s20 + $0x30] sm:$0xff] %v264_v21 }
  0x4b   : > { %281 = vst [vmem:[%s740_s20 + $0x38] sm:$0xff] %v265_v25 }
  0x4c   : > { %282 = vst [vmem:[%s740_s20 + $0x40] sm:$0xff] %v266_v27 }
  0x4d   : > { %283 = vst [vmem:[%s740_s20 + $0x48] sm:$0xff] %v267_v29 }
  0x4e   : > { %284 = vst [vmem:[%s740_s20 + $0x50] sm:$0xff] %v268_v31 }
  0x4f   : > { %285 = vst [vmem:[%s740_s20 + $0x58] sm:$0xff] %v269_v33 }
  0x50   : > { %286 = vst [vmem:[%s740_s20 + $0x60] sm:$0xff] %v270_v35 }
  0x51   : > { %287 = vst [vmem:[%s740_s20 + $0x68] sm:$0xff] %v271_v37 }
  0x52   : > { %288 = vst [vmem:[%s740_s20 + $0x70] sm:$0xff] %v272_v38 }
  0x53   : > { %289 = vst [vmem:[%s740_s20 + $0x78] sm:$0xff] %v273_v39 }
  0x54   : > { %s447_s14 = sshll.u32 %s638_s13, 6  ;;  %s313_s16 = sshll.u32 %s740_s20, 4  ;;  %s314_s16 = int_to_ptr.vmem [resolvable:$true] %s313_s16 }
  0x55   : > { %s302_s4 = scalar_lea.hbm %s809_s2, %s447_s14  ;;  %s596_s25 = smov 1024  }
  0x56   : > { %s315_s17 = sshll.u32 %s302_s4, 4  ;;  %459 = sst [smem:[#allocation11]] (%p665_p9), %s596_s25  ;;  %s316_s17 = int_to_ptr.hbm [resolvable:$true] %s315_s17 }
  0x57   : > { %s597_s26 = smov 2048   ;;  %s598_s23 = smov 8  }
  0x58   : > { %460 = sst [smem:[#allocation11 + $0x1]] (%p665_p9), %s597_s26  ;;  %s599_s24 = smov 128  }
  0x59   : > { %461 = sst [smem:[#allocation11 + $0x2]] (%p665_p9), %s598_s23  ;;  %s600_s13 = smov [#allocation10]  }
  0x5a   : > { %462 = sst [smem:[#allocation11 + $0x3]] (%p665_p9), %s599_s24  ;;  %s601_s27 = smov 0  }
  0x5b   : > { %463 = sst [smem:[#allocation11 + $0x4]] (%p665_p9), %s599_s24 }
  0x5c   : > { %464 = sst [smem:[#allocation11 + $0x5]] (%p665_p9), %s598_s23 }
  0x5d   : > { %465 = dma.general (%p665_p9), %s314_s16, 2048, %s316_s17, %s291_s5, %s600_s13, [#allocation11], %s601_s27, 0  }
  0x5e PF: > { %s343_s28 = sand.u32 1, %s575_s9   ;;  %p468_p5 = pnand %p427_p11, %p669_p10 }
  0x5f   : > { %s344_s29 = scalar_lea.sflag [#allocation4], %s343_s28 }
  0x60   : > { %p469_p6 = pneg %p468_p5 }
  0x62   : > { %570 = dma.done.wait (%p469_p6), %s344_s29, 2048  }
  0x63   : > { %572 = vsyncadd (%p469_p6), %s344_s29, 4294965248  ;;  %p18_p13 = scmp.ge.s32.totalorder %s642_s15, 4   ;;  %s814_s9 = smov %s579_s10 }
  0x64   : > { %s815_s10 = smov %s583_s11  ;;  %s816_s11 = smov %s654_s18 }
  0x65   : > { %s817_s12 = smov %s642_s15  ;;  %20 = sbr.rel (!%p18_p13) target bundleno = 7 (0x7), region = 96 }
  0x6a   :  { %350 = vsyncpa [#allocation3], 1 }
  0x6b   :  { %352 = vsyncpa [#allocation3 + $0x1], 1 }
  0x6c   :  { %353 = vsyncpa [#allocation6], 1 }
  0x6d   :  { %355 = vsyncpa [#allocation6 + $0x1], 1 }
  0x6e   :  { %356 = vsyncpa [#allocation4], 1 }
  0x6f   :  { %358 = vsyncpa [#allocation4 + $0x1], 1 }

</bundles_post_ra>
